<compile_context>
chip_gen: v5e
topology: v5e:2x2
jax: 0.10.0
libtpu: 0.0.40
codegen_flags: <defaults>
</compile_context>

<pallas_src>
import jax
import jax.numpy as jnp
from jax.experimental import pallas as pl
from jax.experimental.pallas import tpu as pltpu

IN_CHANNELS = 4      # params['in_channels']
OUT_CHANNELS = 30    # fixed by the module
KERNEL_SIZE = 30     # fixed by the module

LANE = 128           # TPU lane width
_MAX_TIME_TILE = 2048


def _round_up(x, m):
    return (x + m - 1) // m * m


def _cdiv(a, b):
    return (a + b - 1) // b


def _make_kernel(C, K, CK, CKp, TT):
    def kernel(w_ref, xa_ref, xb_ref, o_ref, patch_ref):
        # (C, 2*TT) window: this time tile plus its right halo (next tile).
        xw = jnp.concatenate([xa_ref[0], xb_ref[0]], axis=-1)

        # In-kernel im2col: patch row (k*C + c) = x[c, t + k] for t in this tile.
        for k in range(K):                               # static, unrolled
            patch_ref[k * C:(k + 1) * C, :] = xw[:, k:k + TT]

        # Bias row (ones) + zero the remaining padded contraction rows.
        # Written every step: scratch is per-core and uninitialized.
        rid = jax.lax.broadcasted_iota(jnp.int32, (CKp - CK, TT), 0)
        patch_ref[CK:CKp, :] = jnp.where(rid == 0, 1.0, 0.0).astype(patch_ref.dtype)

        # One MXU GEMM: (O, CKp) @ (CKp, TT); bias comes from the ones row.
        acc = jnp.dot(w_ref[...], patch_ref[...],
                      preferred_element_type=jnp.float32)
        o_ref[0] = acc.astype(o_ref.dtype)

    return kernel


def conv1d_pallas(x, w, b):
    """Valid 1-D conv, stride 1, with bias.

    x: (N, C, L) f32, w: (O, C, K) f32, b: (O,) f32 -> (N, O, L-K+1) f32
    """
    N, C, L = x.shape
    O, Cw, K = w.shape
    assert Cw == C
    T = L - K + 1
    assert T >= 1, "sequence length must be >= kernel_size"

    CK = C * K
    CKp = _round_up(CK + 1, LANE)        # +1 bias row, padded to lane width (121 -> 128)

    # ---- time-tile selection ----------------------------------------------
    Tp_min = _round_up(T, LANE)
    TT = min(_MAX_TIME_TILE, Tp_min)
    if N * _cdiv(Tp_min, TT) < 2 and Tp_min > LANE:
        # Ensure >= 2 grid steps so v7x megacore can split the work.
        TT = min(TT, _round_up(_cdiv(T, 2), LANE))
    n_t = _cdiv(T, TT)
    Tp = n_t * TT

    # x padded so that block j+1 (right halo) always exists and is zero beyond L.
    Lxp = (n_t + 1) * TT
    x_pad = jnp.pad(x, ((0, 0), (0, 0), (0, Lxp - L)))

    # Weights in patch-row order (row = k*C + c), bias folded into column CK.
    w_perm = jnp.transpose(w, (0, 2, 1)).reshape(O, CK)
    w2 = jnp.zeros((O, CKp), x.dtype).at[:, :CK].set(w_perm).at[:, CK].set(b)

    kernel = _make_kernel(C, K, CK, CKp, TT)

    cost = pl.CostEstimate(
        flops=2 * N * O * Tp * CKp,
        transcendentals=0,
        bytes_accessed=4 * (N * n_t * 2 * C * TT   # x tiles (incl. halo re-read)
                            + O * CKp              # weights (+bias)
                            + N * O * Tp),         # output
    )

    out = pl.pallas_call(
        kernel,
        out_shape=jax.ShapeDtypeStruct((N, O, Tp), x.dtype),
        grid=(N, n_t),
        in_specs=[
            pl.BlockSpec((O, CKp), lambda n, j: (0, 0)),           # weights resident
            pl.BlockSpec((1, C, TT), lambda n, j: (n, 0, j)),      # x time tile
            pl.BlockSpec((1, C, TT), lambda n, j: (n, 0, j + 1)),  # x right-halo tile
        ],
        out_specs=pl.BlockSpec((1, O, TT), lambda n, j: (n, 0, j)),
        scratch_shapes=[pltpu.VMEM((CKp, TT), jnp.float32)],
        compiler_params=pltpu.CompilerParams(
            dimension_semantics=("parallel", "parallel")),
        cost_estimate=cost,
    )(w2, x_pad, x_pad)

    # drop the time padding; output is already (N, O, T) — no transpose needed
    return out[:, :, :T]

# TODO(synk): relu/dropout/linear exist in __init__ but are unused in forward(); not implemented.


if __name__ == "__main__":
    key = jax.random.PRNGKey(0)
    kx, kw, kb = jax.random.split(key, 3)

    # small shapes consistent with the module: batch=2, in_channels=4, L=64
    N, C, L = 2, IN_CHANNELS, 64
    x = jax.random.normal(kx, (N, C, L), jnp.float32)

    # deterministic synthetic parameters (PyTorch-style uniform(-1/sqrt(fan_in), +))
    fan_in = C * KERNEL_SIZE
    bound = 1.0 / (fan_in ** 0.5)
    w = jax.random.uniform(kw, (OUT_CHANNELS, C, KERNEL_SIZE), jnp.float32,
                           minval=-bound, maxval=bound)
    b = jax.random.uniform(kb, (OUT_CHANNELS,), jnp.float32,
                           minval=-bound, maxval=bound)

    conv = jax.jit(conv1d_pallas)
    out = conv(x, w, b)
    jax.block_until_ready(out)

    # pure-JAX reference check (same semantics as torch.nn.Conv1d forward)
    ref = jax.lax.conv_general_dilated(
        x, w, window_strides=(1,), padding="VALID",
        dimension_numbers=("NCH", "OIH", "NCH")) + b[None, :, None]
    assert out.shape == (N, OUT_CHANNELS, L - KERNEL_SIZE + 1)
    assert jnp.allclose(out, ref, atol=1e-3, rtol=1e-3)

    print("KERNEL_OK")
</pallas_src>

<mosaic_0001>
module attributes {stable_mosaic.version = 11 : i64} {
  func.func @kernel(%arg0: i32, %arg1: i32, %arg2: memref<30x128xf32, #tpu.memory_space<vmem>>, %arg3: memref<1x4x128xf32, #tpu.memory_space<vmem>>, %arg4: memref<1x4x128xf32, #tpu.memory_space<vmem>>, %arg5: memref<1x30x128xf32, #tpu.memory_space<vmem>>, %arg6: memref<128x128xf32, #tpu.memory_space<vmem>>) attributes {dimension_semantics = [#tpu.dimension_semantics<parallel>, #tpu.dimension_semantics<parallel>], iteration_bounds = array<i64: 2, 1>, scalar_prefetch = 0 : i64, scratch_operands = 1 : i64, tpu.core_type = #tpu.core_type<tc>, window_params = [{pipeline_mode = #tpu.pipeline_mode<synchronous>, transform_indices = @transform_0, window_bounds = array<i64: 30, 128>}, {transform_indices = @transform_1, window_bounds = array<i64: 1, 4, 128>}, {transform_indices = @transform_2, window_bounds = array<i64: 1, 4, 128>}, {transform_indices = @transform_3, window_bounds = array<i64: 1, 30, 128>}]} {
    %c0 = arith.constant 0 : index
    %c0_0 = arith.constant 0 : index
    %c0_1 = arith.constant 0 : index
    %0 = vector.load %arg3[%c0, %c0_0, %c0_1] : memref<1x4x128xf32, #tpu.memory_space<vmem>>, vector<1x4x128xf32>
    %1 = vector.shape_cast %0 : vector<1x4x128xf32> to vector<4x128xf32>
    %c0_2 = arith.constant 0 : index
    %c0_3 = arith.constant 0 : index
    %c0_4 = arith.constant 0 : index
    %2 = vector.load %arg4[%c0_2, %c0_3, %c0_4] : memref<1x4x128xf32, #tpu.memory_space<vmem>>, vector<1x4x128xf32>
    %3 = vector.shape_cast %2 : vector<1x4x128xf32> to vector<4x128xf32>
    %4 = tpu.concatenate %1, %3 in 1 : vector<4x128xf32>, vector<4x128xf32> -> vector<4x256xf32>
    %5 = vector.extract_strided_slice %4 {offsets = [0, 0], sizes = [4, 128], strides = [1, 1]} : vector<4x256xf32> to vector<4x128xf32>
    %c0_5 = arith.constant 0 : index
    %c0_6 = arith.constant 0 : index
    %6 = vector.load %arg6[%c0_5, %c0_6] : memref<128x128xf32, #tpu.memory_space<vmem>>, vector<4x128xf32>
    tpu.vector_store %arg6[%c0_5, %c0_6], %5 {strides = array<i32>} : memref<128x128xf32, #tpu.memory_space<vmem>>, vector<4x128xf32>,
    %7 = vector.extract_strided_slice %4 {offsets = [0, 1], sizes = [4, 128], strides = [1, 1]} : vector<4x256xf32> to vector<4x128xf32>
    %c4 = arith.constant 4 : index
    %c0_7 = arith.constant 0 : index
    %8 = vector.load %arg6[%c4, %c0_7] : memref<128x128xf32, #tpu.memory_space<vmem>>, vector<4x128xf32>
    tpu.vector_store %arg6[%c4, %c0_7], %7 {strides = array<i32>} : memref<128x128xf32, #tpu.memory_space<vmem>>, vector<4x128xf32>,
    %9 = vector.extract_strided_slice %4 {offsets = [0, 2], sizes = [4, 128], strides = [1, 1]} : vector<4x256xf32> to vector<4x128xf32>
    %c8 = arith.constant 8 : index
    %c0_8 = arith.constant 0 : index
    %10 = vector.load %arg6[%c8, %c0_8] : memref<128x128xf32, #tpu.memory_space<vmem>>, vector<4x128xf32>
    tpu.vector_store %arg6[%c8, %c0_8], %9 {strides = array<i32>} : memref<128x128xf32, #tpu.memory_space<vmem>>, vector<4x128xf32>,
    %11 = vector.extract_strided_slice %4 {offsets = [0, 3], sizes = [4, 128], strides = [1, 1]} : vector<4x256xf32> to vector<4x128xf32>
    %c12 = arith.constant 12 : index
    %c0_9 = arith.constant 0 : index
    %12 = vector.load %arg6[%c12, %c0_9] : memref<128x128xf32, #tpu.memory_space<vmem>>, vector<4x128xf32>
    tpu.vector_store %arg6[%c12, %c0_9], %11 {strides = array<i32>} : memref<128x128xf32, #tpu.memory_space<vmem>>, vector<4x128xf32>,
    %13 = vector.extract_strided_slice %4 {offsets = [0, 4], sizes = [4, 128], strides = [1, 1]} : vector<4x256xf32> to vector<4x128xf32>
    %c16 = arith.constant 16 : index
    %c0_10 = arith.constant 0 : index
    %14 = vector.load %arg6[%c16, %c0_10] : memref<128x128xf32, #tpu.memory_space<vmem>>, vector<4x128xf32>
    tpu.vector_store %arg6[%c16, %c0_10], %13 {strides = array<i32>} : memref<128x128xf32, #tpu.memory_space<vmem>>, vector<4x128xf32>,
    %15 = vector.extract_strided_slice %4 {offsets = [0, 5], sizes = [4, 128], strides = [1, 1]} : vector<4x256xf32> to vector<4x128xf32>
    %c20 = arith.constant 20 : index
    %c0_11 = arith.constant 0 : index
    %16 = vector.load %arg6[%c20, %c0_11] : memref<128x128xf32, #tpu.memory_space<vmem>>, vector<4x128xf32>
    tpu.vector_store %arg6[%c20, %c0_11], %15 {strides = array<i32>} : memref<128x128xf32, #tpu.memory_space<vmem>>, vector<4x128xf32>,
    %17 = vector.extract_strided_slice %4 {offsets = [0, 6], sizes = [4, 128], strides = [1, 1]} : vector<4x256xf32> to vector<4x128xf32>
    %c24 = arith.constant 24 : index
    %c0_12 = arith.constant 0 : index
    %18 = vector.load %arg6[%c24, %c0_12] : memref<128x128xf32, #tpu.memory_space<vmem>>, vector<4x128xf32>
    tpu.vector_store %arg6[%c24, %c0_12], %17 {strides = array<i32>} : memref<128x128xf32, #tpu.memory_space<vmem>>, vector<4x128xf32>,
    %19 = vector.extract_strided_slice %4 {offsets = [0, 7], sizes = [4, 128], strides = [1, 1]} : vector<4x256xf32> to vector<4x128xf32>
    %c28 = arith.constant 28 : index
    %c0_13 = arith.constant 0 : index
    %20 = vector.load %arg6[%c28, %c0_13] : memref<128x128xf32, #tpu.memory_space<vmem>>, vector<4x128xf32>
    tpu.vector_store %arg6[%c28, %c0_13], %19 {strides = array<i32>} : memref<128x128xf32, #tpu.memory_space<vmem>>, vector<4x128xf32>,
    %21 = vector.extract_strided_slice %4 {offsets = [0, 8], sizes = [4, 128], strides = [1, 1]} : vector<4x256xf32> to vector<4x128xf32>
    %c32 = arith.constant 32 : index
    %c0_14 = arith.constant 0 : index
    %22 = vector.load %arg6[%c32, %c0_14] : memref<128x128xf32, #tpu.memory_space<vmem>>, vector<4x128xf32>
    tpu.vector_store %arg6[%c32, %c0_14], %21 {strides = array<i32>} : memref<128x128xf32, #tpu.memory_space<vmem>>, vector<4x128xf32>,
    %23 = vector.extract_strided_slice %4 {offsets = [0, 9], sizes = [4, 128], strides = [1, 1]} : vector<4x256xf32> to vector<4x128xf32>
    %c36 = arith.constant 36 : index
    %c0_15 = arith.constant 0 : index
    %24 = vector.load %arg6[%c36, %c0_15] : memref<128x128xf32, #tpu.memory_space<vmem>>, vector<4x128xf32>
    tpu.vector_store %arg6[%c36, %c0_15], %23 {strides = array<i32>} : memref<128x128xf32, #tpu.memory_space<vmem>>, vector<4x128xf32>,
    %25 = vector.extract_strided_slice %4 {offsets = [0, 10], sizes = [4, 128], strides = [1, 1]} : vector<4x256xf32> to vector<4x128xf32>
    %c40 = arith.constant 40 : index
    %c0_16 = arith.constant 0 : index
    %26 = vector.load %arg6[%c40, %c0_16] : memref<128x128xf32, #tpu.memory_space<vmem>>, vector<4x128xf32>
    tpu.vector_store %arg6[%c40, %c0_16], %25 {strides = array<i32>} : memref<128x128xf32, #tpu.memory_space<vmem>>, vector<4x128xf32>,
    %27 = vector.extract_strided_slice %4 {offsets = [0, 11], sizes = [4, 128], strides = [1, 1]} : vector<4x256xf32> to vector<4x128xf32>
    %c44 = arith.constant 44 : index
    %c0_17 = arith.constant 0 : index
    %28 = vector.load %arg6[%c44, %c0_17] : memref<128x128xf32, #tpu.memory_space<vmem>>, vector<4x128xf32>
    tpu.vector_store %arg6[%c44, %c0_17], %27 {strides = array<i32>} : memref<128x128xf32, #tpu.memory_space<vmem>>, vector<4x128xf32>,
    %29 = vector.extract_strided_slice %4 {offsets = [0, 12], sizes = [4, 128], strides = [1, 1]} : vector<4x256xf32> to vector<4x128xf32>
    %c48 = arith.constant 48 : index
    %c0_18 = arith.constant 0 : index
    %30 = vector.load %arg6[%c48, %c0_18] : memref<128x128xf32, #tpu.memory_space<vmem>>, vector<4x128xf32>
    tpu.vector_store %arg6[%c48, %c0_18], %29 {strides = array<i32>} : memref<128x128xf32, #tpu.memory_space<vmem>>, vector<4x128xf32>,
    %31 = vector.extract_strided_slice %4 {offsets = [0, 13], sizes = [4, 128], strides = [1, 1]} : vector<4x256xf32> to vector<4x128xf32>
    %c52 = arith.constant 52 : index
    %c0_19 = arith.constant 0 : index
    %32 = vector.load %arg6[%c52, %c0_19] : memref<128x128xf32, #tpu.memory_space<vmem>>, vector<4x128xf32>
    tpu.vector_store %arg6[%c52, %c0_19], %31 {strides = array<i32>} : memref<128x128xf32, #tpu.memory_space<vmem>>, vector<4x128xf32>,
    %33 = vector.extract_strided_slice %4 {offsets = [0, 14], sizes = [4, 128], strides = [1, 1]} : vector<4x256xf32> to vector<4x128xf32>
    %c56 = arith.constant 56 : index
    %c0_20 = arith.constant 0 : index
    %34 = vector.load %arg6[%c56, %c0_20] : memref<128x128xf32, #tpu.memory_space<vmem>>, vector<4x128xf32>
    tpu.vector_store %arg6[%c56, %c0_20], %33 {strides = array<i32>} : memref<128x128xf32, #tpu.memory_space<vmem>>, vector<4x128xf32>,
    %35 = vector.extract_strided_slice %4 {offsets = [0, 15], sizes = [4, 128], strides = [1, 1]} : vector<4x256xf32> to vector<4x128xf32>
    %c60 = arith.constant 60 : index
    %c0_21 = arith.constant 0 : index
    %36 = vector.load %arg6[%c60, %c0_21] : memref<128x128xf32, #tpu.memory_space<vmem>>, vector<4x128xf32>
    tpu.vector_store %arg6[%c60, %c0_21], %35 {strides = array<i32>} : memref<128x128xf32, #tpu.memory_space<vmem>>, vector<4x128xf32>,
    %37 = vector.extract_strided_slice %4 {offsets = [0, 16], sizes = [4, 128], strides = [1, 1]} : vector<4x256xf32> to vector<4x128xf32>
    %c64 = arith.constant 64 : index
    %c0_22 = arith.constant 0 : index
    %38 = vector.load %arg6[%c64, %c0_22] : memref<128x128xf32, #tpu.memory_space<vmem>>, vector<4x128xf32>
    tpu.vector_store %arg6[%c64, %c0_22], %37 {strides = array<i32>} : memref<128x128xf32, #tpu.memory_space<vmem>>, vector<4x128xf32>,
    %39 = vector.extract_strided_slice %4 {offsets = [0, 17], sizes = [4, 128], strides = [1, 1]} : vector<4x256xf32> to vector<4x128xf32>
    %c68 = arith.constant 68 : index
    %c0_23 = arith.constant 0 : index
    %40 = vector.load %arg6[%c68, %c0_23] : memref<128x128xf32, #tpu.memory_space<vmem>>, vector<4x128xf32>
    tpu.vector_store %arg6[%c68, %c0_23], %39 {strides = array<i32>} : memref<128x128xf32, #tpu.memory_space<vmem>>, vector<4x128xf32>,
    %41 = vector.extract_strided_slice %4 {offsets = [0, 18], sizes = [4, 128], strides = [1, 1]} : vector<4x256xf32> to vector<4x128xf32>
    %c72 = arith.constant 72 : index
    %c0_24 = arith.constant 0 : index
    %42 = vector.load %arg6[%c72, %c0_24] : memref<128x128xf32, #tpu.memory_space<vmem>>, vector<4x128xf32>
    tpu.vector_store %arg6[%c72, %c0_24], %41 {strides = array<i32>} : memref<128x128xf32, #tpu.memory_space<vmem>>, vector<4x128xf32>,
    %43 = vector.extract_strided_slice %4 {offsets = [0, 19], sizes = [4, 128], strides = [1, 1]} : vector<4x256xf32> to vector<4x128xf32>
    %c76 = arith.constant 76 : index
    %c0_25 = arith.constant 0 : index
    %44 = vector.load %arg6[%c76, %c0_25] : memref<128x128xf32, #tpu.memory_space<vmem>>, vector<4x128xf32>
    tpu.vector_store %arg6[%c76, %c0_25], %43 {strides = array<i32>} : memref<128x128xf32, #tpu.memory_space<vmem>>, vector<4x128xf32>,
    %45 = vector.extract_strided_slice %4 {offsets = [0, 20], sizes = [4, 128], strides = [1, 1]} : vector<4x256xf32> to vector<4x128xf32>
    %c80 = arith.constant 80 : index
    %c0_26 = arith.constant 0 : index
    %46 = vector.load %arg6[%c80, %c0_26] : memref<128x128xf32, #tpu.memory_space<vmem>>, vector<4x128xf32>
    tpu.vector_store %arg6[%c80, %c0_26], %45 {strides = array<i32>} : memref<128x128xf32, #tpu.memory_space<vmem>>, vector<4x128xf32>,
    %47 = vector.extract_strided_slice %4 {offsets = [0, 21], sizes = [4, 128], strides = [1, 1]} : vector<4x256xf32> to vector<4x128xf32>
    %c84 = arith.constant 84 : index
    %c0_27 = arith.constant 0 : index
    %48 = vector.load %arg6[%c84, %c0_27] : memref<128x128xf32, #tpu.memory_space<vmem>>, vector<4x128xf32>
    tpu.vector_store %arg6[%c84, %c0_27], %47 {strides = array<i32>} : memref<128x128xf32, #tpu.memory_space<vmem>>, vector<4x128xf32>,
    %49 = vector.extract_strided_slice %4 {offsets = [0, 22], sizes = [4, 128], strides = [1, 1]} : vector<4x256xf32> to vector<4x128xf32>
    %c88 = arith.constant 88 : index
    %c0_28 = arith.constant 0 : index
    %50 = vector.load %arg6[%c88, %c0_28] : memref<128x128xf32, #tpu.memory_space<vmem>>, vector<4x128xf32>
    tpu.vector_store %arg6[%c88, %c0_28], %49 {strides = array<i32>} : memref<128x128xf32, #tpu.memory_space<vmem>>, vector<4x128xf32>,
    %51 = vector.extract_strided_slice %4 {offsets = [0, 23], sizes = [4, 128], strides = [1, 1]} : vector<4x256xf32> to vector<4x128xf32>
    %c92 = arith.constant 92 : index
    %c0_29 = arith.constant 0 : index
    %52 = vector.load %arg6[%c92, %c0_29] : memref<128x128xf32, #tpu.memory_space<vmem>>, vector<4x128xf32>
    tpu.vector_store %arg6[%c92, %c0_29], %51 {strides = array<i32>} : memref<128x128xf32, #tpu.memory_space<vmem>>, vector<4x128xf32>,
    %53 = vector.extract_strided_slice %4 {offsets = [0, 24], sizes = [4, 128], strides = [1, 1]} : vector<4x256xf32> to vector<4x128xf32>
    %c96 = arith.constant 96 : index
    %c0_30 = arith.constant 0 : index
    %54 = vector.load %arg6[%c96, %c0_30] : memref<128x128xf32, #tpu.memory_space<vmem>>, vector<4x128xf32>
    tpu.vector_store %arg6[%c96, %c0_30], %53 {strides = array<i32>} : memref<128x128xf32, #tpu.memory_space<vmem>>, vector<4x128xf32>,
    %55 = vector.extract_strided_slice %4 {offsets = [0, 25], sizes = [4, 128], strides = [1, 1]} : vector<4x256xf32> to vector<4x128xf32>
    %c100 = arith.constant 100 : index
    %c0_31 = arith.constant 0 : index
    %56 = vector.load %arg6[%c100, %c0_31] : memref<128x128xf32, #tpu.memory_space<vmem>>, vector<4x128xf32>
    tpu.vector_store %arg6[%c100, %c0_31], %55 {strides = array<i32>} : memref<128x128xf32, #tpu.memory_space<vmem>>, vector<4x128xf32>,
    %57 = vector.extract_strided_slice %4 {offsets = [0, 26], sizes = [4, 128], strides = [1, 1]} : vector<4x256xf32> to vector<4x128xf32>
    %c104 = arith.constant 104 : index
    %c0_32 = arith.constant 0 : index
    %58 = vector.load %arg6[%c104, %c0_32] : memref<128x128xf32, #tpu.memory_space<vmem>>, vector<4x128xf32>
    tpu.vector_store %arg6[%c104, %c0_32], %57 {strides = array<i32>} : memref<128x128xf32, #tpu.memory_space<vmem>>, vector<4x128xf32>,
    %59 = vector.extract_strided_slice %4 {offsets = [0, 27], sizes = [4, 128], strides = [1, 1]} : vector<4x256xf32> to vector<4x128xf32>
    %c108 = arith.constant 108 : index
    %c0_33 = arith.constant 0 : index
    %60 = vector.load %arg6[%c108, %c0_33] : memref<128x128xf32, #tpu.memory_space<vmem>>, vector<4x128xf32>
    tpu.vector_store %arg6[%c108, %c0_33], %59 {strides = array<i32>} : memref<128x128xf32, #tpu.memory_space<vmem>>, vector<4x128xf32>,
    %61 = vector.extract_strided_slice %4 {offsets = [0, 28], sizes = [4, 128], strides = [1, 1]} : vector<4x256xf32> to vector<4x128xf32>
    %c112 = arith.constant 112 : index
    %c0_34 = arith.constant 0 : index
    %62 = vector.load %arg6[%c112, %c0_34] : memref<128x128xf32, #tpu.memory_space<vmem>>, vector<4x128xf32>
    tpu.vector_store %arg6[%c112, %c0_34], %61 {strides = array<i32>} : memref<128x128xf32, #tpu.memory_space<vmem>>, vector<4x128xf32>,
    %63 = vector.extract_strided_slice %4 {offsets = [0, 29], sizes = [4, 128], strides = [1, 1]} : vector<4x256xf32> to vector<4x128xf32>
    %c116 = arith.constant 116 : index
    %c0_35 = arith.constant 0 : index
    %64 = vector.load %arg6[%c116, %c0_35] : memref<128x128xf32, #tpu.memory_space<vmem>>, vector<4x128xf32>
    tpu.vector_store %arg6[%c116, %c0_35], %63 {strides = array<i32>} : memref<128x128xf32, #tpu.memory_space<vmem>>, vector<4x128xf32>,
    %65 = tpu.iota {dimensions = array<i32: 0>} : vector<8x128xi32>
    %c0_i32 = arith.constant 0 : i32
    %66 = vector.broadcast %c0_i32 : i32 to vector<8x128xi32>
    %67 = arith.cmpi eq, %65, %66 : vector<8x128xi32>
    %cst = arith.constant 1.000000e+00 : f32
    %cst_36 = arith.constant 0.000000e+00 : f32
    %68 = vector.broadcast %cst : f32 to vector<8x128xf32>
    %69 = vector.broadcast %cst_36 : f32 to vector<8x128xf32>
    %70 = arith.select %67, %68, %69 : vector<8x128xi1>, vector<8x128xf32>
    %c120 = arith.constant 120 : index
    %c0_37 = arith.constant 0 : index
    %71 = vector.load %arg6[%c120, %c0_37] : memref<128x128xf32, #tpu.memory_space<vmem>>, vector<8x128xf32>
    tpu.vector_store %arg6[%c120, %c0_37], %70 {strides = array<i32>} : memref<128x128xf32, #tpu.memory_space<vmem>>, vector<8x128xf32>,
    %c0_38 = arith.constant 0 : index
    %c0_39 = arith.constant 0 : index
    %72 = vector.load %arg2[%c0_38, %c0_39] : memref<30x128xf32, #tpu.memory_space<vmem>>, vector<30x128xf32>
    %c0_40 = arith.constant 0 : index
    %c0_41 = arith.constant 0 : index
    %73 = vector.load %arg6[%c0_40, %c0_41] : memref<128x128xf32, #tpu.memory_space<vmem>>, vector<128x128xf32>
    %cst_42 = arith.constant dense<0.000000e+00> : vector<30x128xf32>
    %74 = tpu.matmul %72, %73, %cst_42 {dimension_numbers = #tpu.dot_dimension_numbers<[1], [0], [0], [1], [0, 0, 1, 1], [], []>} : vector<30x128xf32>, vector<128x128xf32>, vector<30x128xf32> -> vector<30x128xf32>
    %c0_43 = arith.constant 0 : index
    %c0_44 = arith.constant 0 : index
    %c0_45 = arith.constant 0 : index
    %75 = vector.load %arg5[%c0_43, %c0_44, %c0_45] : memref<1x30x128xf32, #tpu.memory_space<vmem>>, vector<1x30x128xf32>
    %76 = vector.shape_cast %75 : vector<1x30x128xf32> to vector<30x128xf32>
    %77 = vector.shape_cast %74 : vector<30x128xf32> to vector<1x30x128xf32>
    tpu.vector_store %arg5[%c0_43, %c0_44, %c0_45], %77 {strides = array<i32>} : memref<1x30x128xf32, #tpu.memory_space<vmem>>, vector<1x30x128xf32>,
    return
  }
  func.func @transform_0(%arg0: i32, %arg1: i32) -> (i32, i32) {
    %c0_i32 = arith.constant 0 : i32
    %c0_i32_0 = arith.constant 0 : i32
    %c0_i32_1 = arith.constant 0 : i32
    return %c0_i32, %c0_i32_0 : i32, i32
  }
  func.func @transform_1(%arg0: i32, %arg1: i32) -> (i32, i32, i32) {
    %c0_i32 = arith.constant 0 : i32
    %c0_i32_0 = arith.constant 0 : i32
    return %arg0, %c0_i32, %arg1 : i32, i32, i32
  }
  func.func @transform_2(%arg0: i32, %arg1: i32) -> (i32, i32, i32) {
    %c1_i32 = arith.constant 1 : i32
    %0 = arith.addi %arg1, %c1_i32 : i32
    %c0_i32 = arith.constant 0 : i32
    %c0_i32_0 = arith.constant 0 : i32
    return %arg0, %c0_i32, %0 : i32, i32, i32
  }
  func.func @transform_3(%arg0: i32, %arg1: i32) -> (i32, i32, i32) {
    %c0_i32 = arith.constant 0 : i32
    %c0_i32_0 = arith.constant 0 : i32
    return %arg0, %c0_i32, %arg1 : i32, i32, i32
  }
}

</mosaic_0001>

<bundles_post_ra>
// kernel: conv1d_pallas.1
= control target key start
LH: loop header
LB: loop body
LE: loop exit
PB: predicated region body
PF: predicated region fallthrough
CT: control target
= control target key end

     0   :  { %s834_s12 = smov 0   ;;  %s836_s13 = smov 0   ;;  %s949_s0 = inlined_call_operand.vmem [shape: f32[30,128], index: 0, kind: input, shape index: {}]   ;;  %s950_s1 = inlined_call_operand.vmem [shape: f32[2,4,256], index: 1, kind: input, shape index: {}, may-alias: {1,2}]   ;;  %s951_s2 = inlined_call_operand.vmem [shape: f32[2,4,256], index: 2, kind: input, shape index: {}, may-alias: {1,2}]   ;;  %s952_s3 = inlined_call_operand.vmem [shape: f32[2,30,128], index: 3, kind: output, shape index: {}]  }
   0x1   :  { %s838_s14 = smov 0  }
   0x2 LB: > { %s25_s15 = sadd.s32 1, %s778_s13  ;;  %p640_p0 = scmp.ge.s32.totalorder %s782_s14, 1  ;;  %s782_s14 = sphi %s838_s14, %s13_s14   ;;  %s778_s13 = sphi %s836_s13, %s954_s13   ;;  %s774_s12 = sphi %s834_s12, %s953_s12  }
   0x3   : > { %p27_p1 = scmp.ge.s32.totalorder %s25_s15, 2  ;;  %p175_p2 = scmp.lt.s32.totalorder %s782_s14, 3 }
   0x5   : > { %s956_s15 = smov (%p27_p1, %s25_s15), 0  ;;  %p176_p3 = pnand %p640_p0, %p175_p2 }
   0x6   : > { %p214_p4 = scmp.lt.s32.totalorder (!%p176_p3), %s774_s12, 1  ;;  %s784_s21 = smov (!%p176_p3), 99  }
   0x7   : > { %179 = sbr.rel (%p176_p3) target bundleno = 428 (0x1ac), region = 32  ;;  %s785_s22 = smov (!%p176_p3), 100  }
   0x8   : > { %s786_s23 = smov (!%p176_p3), 102   ;;  %s787_s27 = smov (!%p176_p3), 101  }
   0x9   : > { %s788_s28 = smov (!%p176_p3), 104   ;;  %s789_s29 = smov (!%p176_p3), 103  }
   0xa   : > { %s790_s30 = smov (!%p176_p3), 106   ;;  %s791_s4 = smov (!%p176_p3), 105  }
   0xb   : > { %s792_s5 = smov (!%p176_p3), 108   ;;  %s793_s6 = smov (!%p176_p3), 107  }
   0xc   : > { %s958_s12 = smov (!%p214_p4, %s774_s12), 1  ;;  %s794_s7 = smov 110   ;;  %v477_v3 = vlaneseq  ;;  %vm449_vm0 = vcmask 834560   ;;  %v804_v6 = vmov 1.0   ;;  %vm473_vm2 = vcmask 809984  }
   0xd   : > { %s649_s16 = sshll.u32 %s958_s12, 3  ;;  %s795_s8 = smov 109   ;;  %vm465_vm3 = vcmask 818176   ;;  %vm457_vm4 = vcmask 826368   ;;  %vm441_vm5 = vcmask 842752   ;;  %vm433_vm6 = vcmask 850944  }
   0xe   : > { %s221_s19 = scalar_lea.vmem %s950_s1, %s649_s16  ;;  %s651_s20 = sadd.s32 4, %s649_s16  ;;  %v478_v4 = vshrl.u32 %v477_v3, 7  ;;  %vm417_vm7 = vcmask 867328   ;;  %vm401_vm8 = vcmask 883712   ;;  %vm425_vm9 = vcmask 859136  }
   0xf   : > { %v858_v0 = vld [vmem:[%s221_s19] sm:$0xf]  ;;  %s230_s26 = scalar_lea.vmem %s951_s2, %s651_s20  ;;  %s796_s9 = smov 112   ;;  %vm409_vm10 = vcmask 875520   ;;  %vm393_vm11 = vcmask 891904   ;;  %vm385_vm12 = vcmask 900096  }
  0x10   : > { %469 = vrot.lane.b32.xlu1 %v858_v0, %s784_s21  ;;  %242 = vst [vmem:[#allocation2] sm:$0xf] %v858_v0  ;;  %461 = vrot.lane.b32.xlu0 %v858_v0, %s785_s22  ;;  %v867_v1 = vld [vmem:[%s230_s26] sm:$0xf]  ;;  %s797_s10 = smov 111   ;;  %s798_s11 = smov 114  }
  0x11   : > { %445 = vrot.lane.b32.xlu2 %v858_v0, %s786_s23  ;;  %s799_s16 = smov 113   ;;  %s800_s17 = smov 116   ;;  %vm479_vm1 = vcmp.eq.s32.totalorder %v478_v4, 0  ;;  %vm369_vm13 = vcmask 916480   ;;  %vm353_vm14 = vcmask 932864   ;;  %vm377_vm15 = vcmask 908288  }
  0x12   : > { %s801_s18 = smov 115   ;;  %s802_s19 = smov 118   ;;  %756 = vmatpush.msk.msra.mxu0 %vm479_vm1, %v804_v6  ;;  %757 = vmatpush.msk.msra.mxu1 %vm479_vm1, %v804_v6 }
  0x13   : > { %s803_s20 = smov 117   ;;  %758 = vmatpush.msk.msra.mxu2 %vm479_vm1, %v804_v6  ;;  %759 = vmatpush.msk.msra.mxu3 %vm479_vm1, %v804_v6  ;;  %s808_s24 = smov 121   ;;  %vm345_vm1 = vcmask 941056  }
  0x14   : > { %s809_s25 = smov 124   ;;  %s810_s26 = smov 123  }
  0x18   : > { %471 = vrot.lane.b32.xlu1 %v867_v1, %s784_s21  ;;  %463 = vrot.lane.b32.xlu0 %v867_v1, %s785_s22  ;;  %s805_s21 = smov 120   ;;  %s806_s22 = smov 119  }
  0x19   : > { %447 = vrot.lane.b32.xlu2 %v867_v1, %s786_s23  ;;  %s807_s23 = smov 122  }
  0x20   : > { %455 = vrot.lane.b32.xlu1 %v867_v1, %s787_s27  ;;  %453 = vrot.lane.b32.xlu0 %v858_v0, %s787_s27  ;;  %s811_s27 = smov 126  }
  0x21   : > { %429 = vrot.lane.b32.xlu2 %v858_v0, %s788_s28 }
  0x28   : > { %437 = vrot.lane.b32.xlu1 %v858_v0, %s789_s29  ;;  %431 = vrot.lane.b32.xlu0 %v867_v1, %s788_s28  ;;  %s812_s28 = smov 125  }
  0x29   : > { %439 = vrot.lane.b32.xlu2 %v867_v1, %s789_s29  ;;  %s813_s29 = smov 127  }
  0x30   : > { %415 = vrot.lane.b32.xlu1 %v867_v1, %s790_s30  ;;  %413 = vrot.lane.b32.xlu0 %v858_v0, %s790_s30 }
  0x31   : > { %421 = vrot.lane.b32.xlu2 %v858_v0, %s791_s4 }
  0x38   : > { %397 = vrot.lane.b32.xlu1 %v858_v0, %s792_s5  ;;  %423 = vrot.lane.b32.xlu0 %v867_v1, %s791_s4 }
  0x39   : > { %399 = vrot.lane.b32.xlu2 %v867_v1, %s792_s5 }
  0x40   : > { %407 = vrot.lane.b32.xlu1 %v867_v1, %s793_s6  ;;  %405 = vrot.lane.b32.xlu0 %v858_v0, %s793_s6 }
  0x41   : > { %381 = vrot.lane.b32.xlu2 %v858_v0, %s794_s7 }
  0x48   : > { %389 = vrot.lane.b32.xlu1 %v858_v0, %s795_s8  ;;  %383 = vrot.lane.b32.xlu0 %v867_v1, %s794_s7 }
  0x49   : > { %391 = vrot.lane.b32.xlu2 %v867_v1, %s795_s8 }
  0x50   : > { %367 = vrot.lane.b32.xlu1 %v867_v1, %s796_s9  ;;  %365 = vrot.lane.b32.xlu0 %v858_v0, %s796_s9 }
  0x51   : > { %373 = vrot.lane.b32.xlu2 %v858_v0, %s797_s10 }
  0x58   : > { %349 = vrot.lane.b32.xlu1 %v858_v0, %s798_s11  ;;  %375 = vrot.lane.b32.xlu0 %v867_v1, %s797_s10 }
  0x59   : > { %351 = vrot.lane.b32.xlu2 %v867_v1, %s798_s11  ;;  %s652_s11 = sshll.u32 %s958_s12, 5 }
  0x60   : > { %359 = vrot.lane.b32.xlu1 %v867_v1, %s799_s16  ;;  %357 = vrot.lane.b32.xlu0 %v858_v0, %s799_s16 }
  0x61   : > { %333 = vrot.lane.b32.xlu2 %v858_v0, %s800_s17 }
  0x68   : > { %341 = vrot.lane.b32.xlu1 %v858_v0, %s801_s18  ;;  %335 = vrot.lane.b32.xlu0 %v867_v1, %s800_s17 }
  0x69   : > { %343 = vrot.lane.b32.xlu2 %v867_v1, %s801_s18  ;;  %s239_s18 = scalar_lea.vmem %s952_s3, %s652_s11 }
  0x6b   : > { %v446_v2 = vpop.permute.xlu2 %445 }
  0x70   : > { %319 = vrot.lane.b32.xlu1 %v867_v1, %s802_s19  ;;  %317 = vrot.lane.b32.xlu0 %v858_v0, %s802_s19 }
  0x71   : > { %325 = vrot.lane.b32.xlu2 %v858_v0, %s803_s20 }
  0x73   : > { %v448_v5 = vpop.permute.xlu2 %447 }
  0x74   : > { %v450_v7 = vsel %vm449_vm0, %v446_v2, %v448_v5  ;;  %vm361_vm0 = vcmask 924672  }
  0x75   : > { %452 = vst [vmem:[#allocation2 + $0x68] sm:$0xf] %v450_v7 }
  0x78   : > { %301 = vrot.lane.b32.xlu1 %v858_v0, %s805_s21  ;;  %327 = vrot.lane.b32.xlu0 %v867_v1, %s803_s20 }
  0x79   : > { %303 = vrot.lane.b32.xlu2 %v867_v1, %s805_s21 }
  0x7b   : > { %v430_v8 = vpop.permute.xlu2 %429 }
  0x80   : > { %311 = vrot.lane.b32.xlu1 %v867_v1, %s806_s22  ;;  %309 = vrot.lane.b32.xlu0 %v858_v0, %s806_s22 }
  0x81   : > { %285 = vrot.lane.b32.xlu2 %v858_v0, %s807_s23 }
  0x82   : > { %v470_v9 = vpop.permute.xlu1 %469  ;;  %v462_v10 = vpop.permute.xlu0 %461 }
  0x83   : > { %v440_v11 = vpop.permute.xlu2 %439 }
  0x88   : > { %293 = vrot.lane.b32.xlu1 %v858_v0, %s808_s24  ;;  %287 = vrot.lane.b32.xlu0 %v867_v1, %s807_s23 }
  0x89   : > { %295 = vrot.lane.b32.xlu2 %v867_v1, %s808_s24 }
  0x8a   : > { %v472_v12 = vpop.permute.xlu1 %471  ;;  %v464_v13 = vpop.permute.xlu0 %463 }
  0x8b   : > { %v474_v14 = vsel %vm473_vm2, %v470_v9, %v472_v12  ;;  %v466_v15 = vsel %vm465_vm3, %v462_v10, %v464_v13  ;;  %v422_v16 = vpop.permute.xlu2 %421  ;;  %vm337_vm2 = vcmask 949248   ;;  %vm321_vm3 = vcmask 965632  }
  0x8c   : > { %476 = vst [vmem:[#allocation2 + $0x74] sm:$0xf] %v474_v14 }
  0x8d   : > { %468 = vst [vmem:[#allocation2 + $0x70] sm:$0xf] %v466_v15 }
  0x90   : > { %271 = vrot.lane.b32.xlu1 %v867_v1, %s809_s25  ;;  %269 = vrot.lane.b32.xlu0 %v858_v0, %s809_s25 }
  0x91   : > { %277 = vrot.lane.b32.xlu2 %v858_v0, %s810_s26 }
  0x92   : > { %v456_v17 = vpop.permute.xlu1 %455  ;;  %v454_v18 = vpop.permute.xlu0 %453 }
  0x93   : > { %v458_v19 = vsel %vm457_vm4, %v454_v18, %v456_v17  ;;  %v400_v20 = vpop.permute.xlu2 %399  ;;  %vm305_vm4 = vcmask 982016  }
  0x94   : > { %460 = vst [vmem:[#allocation2 + $0x6c] sm:$0xf] %v458_v19  ;;  %v500_v21 = vld [vmem:[#allocation2 + $0x70] sm:$0xff] }
  0x95   : > { %503 = vmatpush.msra.mxu0 %v500_v21  ;;  %657 = vmatpush.msra.mxu1 %v500_v21 }
  0x96   : > { %658 = vmatpush.msra.mxu2 %v500_v21  ;;  %659 = vmatpush.msra.mxu3 %v500_v21 }
  0x98   : > { %253 = vrot.lane.b32.xlu1 %v858_v0, %s811_s27  ;;  %279 = vrot.lane.b32.xlu0 %v867_v1, %s810_s26 }
  0x99   : > { %255 = vrot.lane.b32.xlu2 %v867_v1, %s811_s27 }
  0x9a   : > { %v438_v22 = vpop.permute.xlu1 %437  ;;  %v432_v23 = vpop.permute.xlu0 %431 }
  0x9b   : > { %v442_v24 = vsel %vm441_vm5, %v438_v22, %v440_v11  ;;  %v434_v25 = vsel %vm433_vm6, %v430_v8, %v432_v23  ;;  %v499_v26 = vld [vmem:[#allocation2 + $0x68] sm:$0xff]  ;;  %v382_v27 = vpop.permute.xlu2 %381  ;;  %vm329_vm5 = vcmask 957440   ;;  %vm313_vm6 = vcmask 973824  }
  0x9c   : > { %444 = vst [vmem:[#allocation2 + $0x64] sm:$0xf] %v442_v24  ;;  %504 = vmatpush.msra.mxu0 %v499_v26  ;;  %660 = vmatpush.msra.mxu1 %v499_v26 }
  0x9d   : > { %436 = vst [vmem:[#allocation2 + $0x60] sm:$0xf] %v434_v25  ;;  %661 = vmatpush.msra.mxu2 %v499_v26  ;;  %662 = vmatpush.msra.mxu3 %v499_v26 }
  0xa0   : > { %263 = vrot.lane.b32.xlu1 %v867_v1, %s812_s28  ;;  %261 = vrot.lane.b32.xlu0 %v858_v0, %s812_s28 }
  0xa1   : > { %245 = vrot.lane.b32.xlu2 %v858_v0, %s813_s29 }
  0xa2   : > { %v416_v28 = vpop.permute.xlu1 %415  ;;  %v414_v29 = vpop.permute.xlu0 %413 }
  0xa3   : > { %v418_v30 = vsel %vm417_vm7, %v414_v29, %v416_v28  ;;  %v392_v32 = vpop.permute.xlu2 %391  ;;  %vm297_vm7 = vcmask 990208  }
  0xa4   : > { %420 = vst [vmem:[#allocation2 + $0x58] sm:$0xf] %v418_v30  ;;  %v498_v31 = vld [vmem:[#allocation2 + $0x60] sm:$0xff] }
  0xa5   : > { %505 = vmatpush.msra.mxu0 %v498_v31  ;;  %663 = vmatpush.msra.mxu1 %v498_v31 }
  0xa6   : > { %664 = vmatpush.msra.mxu2 %v498_v31  ;;  %665 = vmatpush.msra.mxu3 %v498_v31 }
  0xa8   : > { %247 = vrot.lane.b32.xlu0 %v867_v1, %s813_s29 }
  0xaa   : > { %v398_v33 = vpop.permute.xlu1 %397  ;;  %v424_v34 = vpop.permute.xlu0 %423 }
  0xab   : > { %v402_v35 = vsel %vm401_vm8, %v398_v33, %v400_v20  ;;  %v426_v36 = vsel %vm425_vm9, %v422_v16, %v424_v34  ;;  %v374_v37 = vpop.permute.xlu2 %373  ;;  %vm289_vm8 = vcmask 998400   ;;  %vm273_vm9 = vcmask 1014784  }
  0xac   : > { %404 = vst [vmem:[#allocation2 + $0x50] sm:$0xf] %v402_v35 }
  0xad   : > { %428 = vst [vmem:[#allocation2 + $0x5c] sm:$0xf] %v426_v36 }
  0xb2   : > { %v408_v38 = vpop.permute.xlu1 %407  ;;  %v406_v39 = vpop.permute.xlu0 %405 }
  0xb3   : > { %v410_v40 = vsel %vm409_vm10, %v406_v39, %v408_v38  ;;  %v352_v42 = vpop.permute.xlu2 %351  ;;  %vm281_vm10 = vcmask 1006592  }
  0xb4   : > { %412 = vst [vmem:[#allocation2 + $0x54] sm:$0xf] %v410_v40  ;;  %v497_v41 = vld [vmem:[#allocation2 + $0x58] sm:$0xff] }
  0xb5   : > { %506 = vmatpush.msra.mxu0 %v497_v41  ;;  %666 = vmatpush.msra.mxu1 %v497_v41 }
  0xb6   : > { %667 = vmatpush.msra.mxu2 %v497_v41  ;;  %668 = vmatpush.msra.mxu3 %v497_v41 }
  0xba   : > { %v390_v43 = vpop.permute.xlu1 %389  ;;  %v384_v44 = vpop.permute.xlu0 %383 }
  0xbb   : > { %v394_v45 = vsel %vm393_vm11, %v390_v43, %v392_v32  ;;  %v386_v46 = vsel %vm385_vm12, %v382_v27, %v384_v44  ;;  %v496_v47 = vld [vmem:[#allocation2 + $0x50] sm:$0xff]  ;;  %v334_v51 = vpop.permute.xlu2 %333  ;;  %vm257_vm11 = vcmask 1031168   ;;  %vm265_vm12 = vcmask 1022976   ;;  %v485_v44 = vld [vmem:[%s949_s0 + $0x18] sm:$0x3f] }
  0xbc   : > { %396 = vst [vmem:[#allocation2 + $0x4c] sm:$0xf] %v394_v45  ;;  %507 = vmatpush.msra.mxu0 %v496_v47  ;;  %669 = vmatpush.msra.mxu1 %v496_v47  ;;  %v484_v43 = vld [vmem:[%s949_s0 + $0x10] sm:$0xff]  ;;  %v482_v45 = vld [vmem:[%s949_s0] sm:$0xff] }
  0xbd   : > { %388 = vst [vmem:[#allocation2 + $0x48] sm:$0xf] %v386_v46  ;;  %670 = vmatpush.msra.mxu2 %v496_v47  ;;  %671 = vmatpush.msra.mxu3 %v496_v47  ;;  %v483_v46 = vld [vmem:[%s949_s0 + $0x8] sm:$0xff] }
  0xc2   : > { %v368_v48 = vpop.permute.xlu1 %367  ;;  %v366_v49 = vpop.permute.xlu0 %365 }
  0xc3   : > { %v370_v50 = vsel %vm369_vm13, %v366_v49, %v368_v48  ;;  %v344_v57 = vpop.permute.xlu2 %343  ;;  %vm249_vm13 = vcmask 1039360  }
  0xc4   : > { %372 = vst [vmem:[#allocation2 + $0x40] sm:$0xf] %v370_v50  ;;  %v495_v52 = vld [vmem:[#allocation2 + $0x48] sm:$0xff] }
  0xc5   : > { %508 = vmatpush.msra.mxu0 %v495_v52  ;;  %672 = vmatpush.msra.mxu1 %v495_v52 }
  0xc6   : > { %673 = vmatpush.msra.mxu2 %v495_v52  ;;  %674 = vmatpush.msra.mxu3 %v495_v52 }
  0xca   : > { %v350_v53 = vpop.permute.xlu1 %349  ;;  %v376_v54 = vpop.permute.xlu0 %375 }
  0xcb   : > { %v354_v55 = vsel %vm353_vm14, %v350_v53, %v352_v42  ;;  %v378_v56 = vsel %vm377_vm15, %v374_v37, %v376_v54  ;;  %v326_v62 = vpop.permute.xlu2 %325 }
  0xcc   : > { %356 = vst [vmem:[#allocation2 + $0x38] sm:$0xf] %v354_v55 }
  0xcd   : > { %380 = vst [vmem:[#allocation2 + $0x44] sm:$0xf] %v378_v56 }
  0xd2   : > { %v360_v58 = vpop.permute.xlu1 %359  ;;  %v358_v59 = vpop.permute.xlu0 %357 }
  0xd3   : > { %v362_v60 = vsel %vm361_vm0, %v358_v59, %v360_v58  ;;  %v304_v4 = vpop.permute.xlu2 %303 }
  0xd4   : > { %364 = vst [vmem:[#allocation2 + $0x3c] sm:$0xf] %v362_v60  ;;  %v494_v61 = vld [vmem:[#allocation2 + $0x40] sm:$0xff] }
  0xd5   : > { %509 = vmatpush.msra.mxu0 %v494_v61  ;;  %675 = vmatpush.msra.mxu1 %v494_v61 }
  0xd6   : > { %676 = vmatpush.msra.mxu2 %v494_v61  ;;  %677 = vmatpush.msra.mxu3 %v494_v61 }
  0xda   : > { %v342_v63 = vpop.permute.xlu1 %341  ;;  %v336_v0 = vpop.permute.xlu0 %335 }
  0xdb   : > { %v346_v1 = vsel %vm345_vm1, %v342_v63, %v344_v57  ;;  %v338_v2 = vsel %vm337_vm2, %v334_v51, %v336_v0  ;;  %v493_v3 = vld [vmem:[#allocation2 + $0x38] sm:$0xff]  ;;  %v286_v13 = vpop.permute.xlu2 %285 }
  0xdc   : > { %348 = vst [vmem:[#allocation2 + $0x34] sm:$0xf] %v346_v1  ;;  %510 = vmatpush.msra.mxu0 %v493_v3  ;;  %678 = vmatpush.msra.mxu1 %v493_v3 }
  0xdd   : > { %340 = vst [vmem:[#allocation2 + $0x30] sm:$0xf] %v338_v2  ;;  %679 = vmatpush.msra.mxu2 %v493_v3  ;;  %680 = vmatpush.msra.mxu3 %v493_v3 }
  0xe2   : > { %v320_v5 = vpop.permute.xlu1 %319  ;;  %v318_v6 = vpop.permute.xlu0 %317 }
  0xe3   : > { %v322_v7 = vsel %vm321_vm3, %v318_v6, %v320_v5  ;;  %v296_v18 = vpop.permute.xlu2 %295 }
  0xe4   : > { %324 = vst [vmem:[#allocation2 + $0x28] sm:$0xf] %v322_v7  ;;  %v492_v8 = vld [vmem:[#allocation2 + $0x30] sm:$0xff] }
  0xe5   : > { %511 = vmatpush.msra.mxu0 %v492_v8  ;;  %681 = vmatpush.msra.mxu1 %v492_v8 }
  0xe6   : > { %682 = vmatpush.msra.mxu2 %v492_v8  ;;  %683 = vmatpush.msra.mxu3 %v492_v8 }
  0xea   : > { %v302_v9 = vpop.permute.xlu1 %301  ;;  %v328_v10 = vpop.permute.xlu0 %327 }
  0xeb   : > { %v306_v11 = vsel %vm305_vm4, %v302_v9, %v304_v4  ;;  %v330_v12 = vsel %vm329_vm5, %v326_v62, %v328_v10  ;;  %v278_v24 = vpop.permute.xlu2 %277 }
  0xec   : > { %308 = vst [vmem:[#allocation2 + $0x20] sm:$0xf] %v306_v11 }
  0xed   : > { %332 = vst [vmem:[#allocation2 + $0x2c] sm:$0xf] %v330_v12 }
  0xf2   : > { %v312_v14 = vpop.permute.xlu1 %311  ;;  %v310_v15 = vpop.permute.xlu0 %309 }
  0xf3   : > { %v314_v16 = vsel %vm313_vm6, %v310_v15, %v312_v14  ;;  %v256_v29 = vpop.permute.xlu2 %255 }
  0xf4   : > { %316 = vst [vmem:[#allocation2 + $0x24] sm:$0xf] %v314_v16  ;;  %v491_v17 = vld [vmem:[#allocation2 + $0x28] sm:$0xff] }
  0xf5   : > { %512 = vmatpush.msra.mxu0 %v491_v17  ;;  %684 = vmatpush.msra.mxu1 %v491_v17 }
  0xf6   : > { %685 = vmatpush.msra.mxu2 %v491_v17  ;;  %686 = vmatpush.msra.mxu3 %v491_v17 }
  0xfa   : > { %v294_v19 = vpop.permute.xlu1 %293  ;;  %v288_v20 = vpop.permute.xlu0 %287 }
  0xfb   : > { %v298_v21 = vsel %vm297_vm7, %v294_v19, %v296_v18  ;;  %v290_v22 = vsel %vm289_vm8, %v286_v13, %v288_v20  ;;  %v490_v23 = vld [vmem:[#allocation2 + $0x20] sm:$0xff]  ;;  %v246_v38 = vpop.permute.xlu2 %245 }
  0xfc   : > { %300 = vst [vmem:[#allocation2 + $0x1c] sm:$0xf] %v298_v21  ;;  %513 = vmatpush.msra.mxu0 %v490_v23  ;;  %687 = vmatpush.msra.mxu1 %v490_v23 }
  0xfd   : > { %292 = vst [vmem:[#allocation2 + $0x18] sm:$0xf] %v290_v22  ;;  %688 = vmatpush.msra.mxu2 %v490_v23  ;;  %689 = vmatpush.msra.mxu3 %v490_v23 }
 0x102   : > { %v272_v25 = vpop.permute.xlu1 %271  ;;  %v270_v26 = vpop.permute.xlu0 %269 }
 0x103   : > { %v274_v27 = vsel %vm273_vm9, %v270_v26, %v272_v25 }
 0x104   : > { %276 = vst [vmem:[#allocation2 + $0x10] sm:$0xf] %v274_v27  ;;  %v489_v28 = vld [vmem:[#allocation2 + $0x18] sm:$0xff] }
 0x105   : > { %514 = vmatpush.msra.mxu0 %v489_v28  ;;  %690 = vmatpush.msra.mxu1 %v489_v28 }
 0x106   : > { %691 = vmatpush.msra.mxu2 %v489_v28  ;;  %692 = vmatpush.msra.mxu3 %v489_v28 }
 0x10a   : > { %v254_v30 = vpop.permute.xlu1 %253  ;;  %v280_v31 = vpop.permute.xlu0 %279 }
 0x10b   : > { %v282_v32 = vsel %vm281_vm10, %v278_v24, %v280_v31  ;;  %v258_v33 = vsel %vm257_vm11, %v254_v30, %v256_v29 }
 0x10c   : > { %284 = vst [vmem:[#allocation2 + $0x14] sm:$0xf] %v282_v32 }
 0x10d   : > { %260 = vst [vmem:[#allocation2 + $0x8] sm:$0xf] %v258_v33 }
 0x112   : > { %v264_v34 = vpop.permute.xlu1 %263  ;;  %v262_v35 = vpop.permute.xlu0 %261 }
 0x113   : > { %v266_v36 = vsel %vm265_vm12, %v262_v35, %v264_v34  ;;  %v488_v37 = vld [vmem:[#allocation2 + $0x10] sm:$0xff] }
 0x114   : > { %268 = vst [vmem:[#allocation2 + $0xc] sm:$0xf] %v266_v36  ;;  %515 = vmatpush.msra.mxu0 %v488_v37  ;;  %693 = vmatpush.msra.mxu1 %v488_v37 }
 0x115   : > { %694 = vmatpush.msra.mxu2 %v488_v37  ;;  %695 = vmatpush.msra.mxu3 %v488_v37 }
 0x11a   : > { %v248_v39 = vpop.permute.xlu0 %247 }
 0x11b   : > { %v250_v40 = vsel %vm249_vm13, %v246_v38, %v248_v39  ;;  %v487_v41 = vld [vmem:[#allocation2 + $0x8] sm:$0xff] }
 0x11c   : > { %252 = vst [vmem:[#allocation2 + $0x4] sm:$0xf] %v250_v40  ;;  %516 = vmatpush.msra.mxu0 %v487_v41  ;;  %696 = vmatpush.msra.mxu1 %v487_v41 }
 0x11d   : > { %697 = vmatpush.msra.mxu2 %v487_v41  ;;  %698 = vmatpush.msra.mxu3 %v487_v41 }
 0x123   : > { %v486_v42 = vld [vmem:[#allocation2] sm:$0xff] }
 0x124   : > { %517 = vmatpush.msra.mxu0 %v486_v42  ;;  %699 = vmatpush.msra.mxu1 %v486_v42 }
 0x125   : > { %700 = vmatpush.msra.mxu2 %v486_v42  ;;  %701 = vmatpush.msra.mxu3 %v486_v42 }
 0x126   : > { %524 = vmatmul.f32.vlgmr.msra.gmra.mxu2 %v484_v43  ;;  %527 = vmatmul.f32.vlgmr.msra.gmra.mxu3 %v485_v44 }
 0x127   : > { %518 = vmatmul.f32.vlgmr.msra.gmra.mxu0 %v482_v45  ;;  %521 = vmatmul.f32.vlgmr.msra.gmra.mxu1 %v483_v46 }
 0x1a4   : > { %v519_v47 = vpop.f32.mrf.mxu0  ;;  %v522_v48 = vpop.f32.mrf.mxu1 }
 0x1a5   : > { %531 = vst [vmem:[%s239_s18] sm:$0xff] %v519_v47 }
 0x1a6   : > { %532 = vst [vmem:[%s239_s18 + $0x8] sm:$0xff] %v522_v48 }
 0x1a9   : > { %v525_v49 = vpop.f32.mrf.mxu2  ;;  %v528_v50 = vpop.f32.mrf.mxu3 }
 0x1aa   : > { %533 = vst [vmem:[%s239_s18 + $0x10] sm:$0xff] %v525_v49 }
 0x1ab   : > { %534 = vst [vmem:[%s239_s18 + $0x18] sm:$0x3f] %v528_v50 }
 0x1ac PF: > { %s13_s14 = sadd.s32 1, %s782_s14   ;;  %s953_s12 = smov %s778_s13 }
 0x1ad   : > { %p10_p5 = scmp.ge.s32.totalorder %s13_s14, 4   ;;  %s954_s13 = smov %s956_s15 }
 0x1af   :  { %12 = sbr.rel (!%p10_p5) target bundleno = 2 (0x2), region = 65 }

</bundles_post_ra>
